<compile_context>
chip_gen: v7x
topology: tpu7x:2x2x1
jax: 0.10.0
libtpu: 0.0.40
codegen_flags: <defaults>
</compile_context>

<pallas_src>
import jax
import jax.numpy as jnp
from jax.experimental import pallas as pl
from jax.experimental.pallas import tpu as pltpu

LANE = 128


def trailer_visual_kernel(x_ref, w1_ref, b1_ref, w2_ref, b2_ref, out_ref):
    # x_ref:  (B, S*D) bf16 — mean-over-S folded into the K dim of the first
    #         matmul (W1 tiled S times along rows; 1/S + eval-mode BN folded
    #         into weight/bias), so the clip reduction runs on the MXU.
    # w1_ref: (S*D, H) bf16, b1_ref: (1, H) f32
    # w2_ref: (H, C_pad) bf16, b2_ref: (1, C_pad) f32
    h = jnp.dot(x_ref[...], w1_ref[...], preferred_element_type=jnp.float32)
    h = h + b1_ref[...]
    h = jnp.maximum(h, 0.0)          # ReLU — keep the epilogue f32 (no bf16 VPU on v5e)
    # TODO(synk): Dropout(p=0.5) is identity in eval-mode forward.

    # visual_dense2: Linear(H, C_pad) — C zero-padded to a lane multiple so the
    # output store is an unmasked lane-dense (B, 128) tile.
    y = jnp.dot(h.astype(jnp.bfloat16), w2_ref[...],
                preferred_element_type=jnp.float32)
    out_ref[...] = (y + b2_ref[...]).astype(out_ref.dtype)


def _round_up(n, m):
    return (n + m - 1) // m * m


def prepare_params(params, S):
    """Eval-mode fold ONLY (BatchNorm running stats, Dropout = identity).

    Folds gamma*rsqrt(var+eps) and the 1/S mean into W1/b1, then tiles W1 S
    times along rows so the sum over clips becomes part of the first matmul's
    K dimension.  Pads C to a lane multiple and casts MXU weights to bf16.
    NOT valid for training-mode BatchNorm.
    """
    w1_t, b1, gamma, beta, rm, rv, w2_t, b2 = params   # all f32, PyTorch layout^T
    eps = 1e-5
    scale = gamma * jax.lax.rsqrt(rv + eps)            # (1, H)
    w1_f = (w1_t * scale) * (1.0 / S)                  # (D, H): BN scale + mean div
    b1_f = (b1 - rm) * scale + beta                    # (1, H)
    w1_k = jnp.tile(w1_f, (S, 1))                      # (S*D, H): fold sum-over-S into K

    _, C = w2_t.shape
    c_pad = _round_up(C, LANE)
    w2_p = jnp.pad(w2_t, ((0, 0), (0, c_pad - C)))     # (H, C_pad)
    b2_p = jnp.pad(b2, ((0, 0), (0, c_pad - C)))       # (1, C_pad)

    folded = (w1_k.astype(jnp.bfloat16),
              b1_f.astype(jnp.float32),
              w2_p.astype(jnp.bfloat16),
              b2_p.astype(jnp.float32))
    return folded, C


def trailer_visual_forward(x, folded_params, num_category):
    """x: (B, S, D) float32. Returns dict mirroring the PyTorch module."""
    B, S, D = x.shape
    w1_k, b1_f, w2_p, b2_p = folded_params
    assert w1_k.shape[0] == S * D, "folded params were prepared for a different S*D"
    H = w1_k.shape[1]
    c_pad = w2_p.shape[1]

    # Lane-dense (B, S*D) bf16 input: halves the only significant DMA and
    # removes the in-kernel f32->bf16 pack (MXU accumulates in f32 anyway).
    x2 = x.reshape(B, S * D).astype(jnp.bfloat16)

    flops = 2 * B * (S * D * H + H * c_pad)
    bytes_accessed = (x2.size * 2 + w1_k.size * 2 + b1_f.size * 4
                      + w2_p.size * 2 + b2_p.size * 4 + B * c_pad * 4)

    vmem_spec = pl.BlockSpec(memory_space=pltpu.MemorySpace.VMEM)
    y_pad = pl.pallas_call(
        trailer_visual_kernel,
        out_shape=jax.ShapeDtypeStruct((B, c_pad), jnp.float32),
        in_specs=[vmem_spec] * 5,
        out_specs=vmem_spec,
        cost_estimate=pl.CostEstimate(
            flops=flops, transcendentals=0, bytes_accessed=bytes_accessed),
    )(x2, w1_k, b1_f, w2_p, b2_p)

    y = y_pad[:, :num_category]
    return {"visual_output": y, "multimodal_output": y}


def init_params(key, visual_feature_dim, hidden_dim, num_category):
    """Deterministic synthetic parameters matching the nn.Module shapes."""
    k1, k2, k3, k4 = jax.random.split(key, 4)
    D, H, C = visual_feature_dim, hidden_dim, num_category
    # nn.Linear(D, H): weight (H, D), bias (H,) -> stored transposed (D, H)
    w1 = jax.random.normal(k1, (H, D), jnp.float32) * 0.02
    b1 = jax.random.normal(k2, (H,), jnp.float32) * 0.01
    # BatchNorm1d(H) defaults: gamma=1, beta=0, running_mean=0, running_var=1
    gamma = jnp.ones((H,), jnp.float32)
    beta = jnp.zeros((H,), jnp.float32)
    rm = jnp.zeros((H,), jnp.float32)
    rv = jnp.ones((H,), jnp.float32)
    # nn.Linear(H, C)
    w2 = jax.random.normal(k3, (C, H), jnp.float32) * 0.02
    b2 = jax.random.normal(k4, (C,), jnp.float32) * 0.01
    return (
        w1.T,                  # (D, H)
        b1.reshape(1, H),
        gamma.reshape(1, H),
        beta.reshape(1, H),
        rm.reshape(1, H),
        rv.reshape(1, H),
        w2.T,                  # (H, C)
        b2.reshape(1, C),
    )


if __name__ == "__main__":
    # Small shapes consistent with the module: (batch, num_clips, feature_dim)
    B, S, D = 8, 8, 256
    H, C = 128, 21

    key = jax.random.PRNGKey(0)
    kx, kp = jax.random.split(key)
    x = jax.random.normal(kx, (B, S, D), jnp.float32)
    raw_params = init_params(kp, D, H, C)
    folded_params, num_category = prepare_params(raw_params, S)

    out = trailer_visual_forward(x, folded_params, num_category)
    y = jax.block_until_ready(out["visual_output"])

    # Pure-JAX f32 reference of the PyTorch eval-mode forward (unfolded params).
    w1_t, b1, gamma, beta, rm, rv, w2_t, b2 = raw_params
    xm = jnp.mean(x, axis=1)
    h_ref = xm @ w1_t + b1
    h_ref = (h_ref - rm) * jax.lax.rsqrt(rv + 1e-5) * gamma + beta
    h_ref = jnp.maximum(h_ref, 0.0)
    y_ref = h_ref @ w2_t + b2

    assert y.shape == (B, C)
    assert out["multimodal_output"].shape == (B, C)
    # bf16 MXU operands (x, folded W1, W2) with f32 accumulation -> loose-ish tolerance.
    assert jnp.allclose(y, y_ref, atol=1e-2, rtol=1e-2), "mismatch vs reference"

    print("KERNEL_OK")
</pallas_src>

<mosaic_0001>
module attributes {stable_mosaic.version = 11 : i64} {
  func.func @trailer_visual_kernel(%arg0: memref<8x2048xbf16, #tpu.memory_space<vmem>>, %arg1: memref<2048x128xbf16, #tpu.memory_space<vmem>>, %arg2: memref<1x128xf32, #tpu.memory_space<vmem>>, %arg3: memref<128x128xbf16, #tpu.memory_space<vmem>>, %arg4: memref<1x128xf32, #tpu.memory_space<vmem>>, %arg5: memref<8x128xf32, #tpu.memory_space<vmem>>) attributes {dimension_semantics = [], scalar_prefetch = 0 : i64, scratch_operands = 0 : i64, tpu.core_type = #tpu.core_type<tc>} {
    %c0 = arith.constant 0 : index
    %c0_0 = arith.constant 0 : index
    %0 = vector.load %arg0[%c0, %c0_0] : memref<8x2048xbf16, #tpu.memory_space<vmem>>, vector<8x2048xbf16>
    %c0_1 = arith.constant 0 : index
    %c0_2 = arith.constant 0 : index
    %1 = vector.load %arg1[%c0_1, %c0_2] : memref<2048x128xbf16, #tpu.memory_space<vmem>>, vector<2048x128xbf16>
    %cst = arith.constant dense<0.000000e+00> : vector<8x128xf32>
    %2 = tpu.matmul %0, %1, %cst {dimension_numbers = #tpu.dot_dimension_numbers<[1], [0], [0], [1], [0, 0, 1, 1], [], []>} : vector<8x2048xbf16>, vector<2048x128xbf16>, vector<8x128xf32> -> vector<8x128xf32>
    %c0_3 = arith.constant 0 : index
    %c0_4 = arith.constant 0 : index
    %3 = vector.load %arg2[%c0_3, %c0_4] : memref<1x128xf32, #tpu.memory_space<vmem>>, vector<1x128xf32>
    %4 = vector.broadcast %3 : vector<1x128xf32> to vector<8x128xf32>
    %5 = arith.addf %2, %4 : vector<8x128xf32>
    %cst_5 = arith.constant 0.000000e+00 : f32
    %6 = vector.broadcast %cst_5 : f32 to vector<8x128xf32>
    %7 = arith.maximumf %5, %6 : vector<8x128xf32>
    %8 = arith.truncf %7 : vector<8x128xf32> to vector<8x128xbf16>
    %c0_6 = arith.constant 0 : index
    %c0_7 = arith.constant 0 : index
    %9 = vector.load %arg3[%c0_6, %c0_7] : memref<128x128xbf16, #tpu.memory_space<vmem>>, vector<128x128xbf16>
    %cst_8 = arith.constant dense<0.000000e+00> : vector<8x128xf32>
    %10 = tpu.matmul %8, %9, %cst_8 {dimension_numbers = #tpu.dot_dimension_numbers<[1], [0], [0], [1], [0, 0, 1, 1], [], []>} : vector<8x128xbf16>, vector<128x128xbf16>, vector<8x128xf32> -> vector<8x128xf32>
    %c0_9 = arith.constant 0 : index
    %c0_10 = arith.constant 0 : index
    %11 = vector.load %arg4[%c0_9, %c0_10] : memref<1x128xf32, #tpu.memory_space<vmem>>, vector<1x128xf32>
    %12 = vector.broadcast %11 : vector<1x128xf32> to vector<8x128xf32>
    %13 = arith.addf %10, %12 : vector<8x128xf32>
    %c0_11 = arith.constant 0 : index
    %c0_12 = arith.constant 0 : index
    %14 = vector.load %arg5[%c0_11, %c0_12] : memref<8x128xf32, #tpu.memory_space<vmem>>, vector<8x128xf32>
    tpu.vector_store %arg5[%c0_11, %c0_12], %13 {strides = array<i32>} : memref<8x128xf32, #tpu.memory_space<vmem>>, vector<8x128xf32>,
    return
  }
}

</mosaic_0001>

<bundles_post_ra>
// kernel: tpu_custom_call.1
= control target key start
LH: loop header
LB: loop body
LE: loop exit
PB: predicated region body
PF: predicated region fallthrough
CT: control target
= control target key end

     0   :  { %10 = vsyncpa [#allocation3], 0  ;;  %s2317_s0 = inlined_call_operand.hbm [shape: bf16[8,2048], index: 0, kind: input, shape index: {}]   ;;  %s2318_s1 = inlined_call_operand.hbm [shape: bf16[2048,128], index: 1, kind: input, shape index: {}]   ;;  %s2319_s2 = inlined_call_operand.vmem [shape: f32[1,128], index: 2, kind: input, shape index: {}]   ;;  %s2320_s3 = inlined_call_operand.hbm [shape: bf16[128,128], index: 3, kind: input, shape index: {}]   ;;  %s2321_s4 = inlined_call_operand.vmem [shape: f32[1,128], index: 4, kind: input, shape index: {}]   ;;  %s2322_s5 = inlined_call_operand.hbm [shape: f32[8,128], index: 5, kind: output, shape index: {}]  }
   0x1   :  { %11 = vsyncpa [#allocation6], 0 }
   0x2   :  { %12 = vsyncpa [#allocation4], 0  ;;  %s2219_s18 = smov [#allocation5]   ;;  %s2125_s22 = scalar_lea.hbm %s2318_s1, 16384 }
   0x3   :  { %s28_s19 = sshll.u32 %s2219_s18, 4  ;;  %p2126_p0 = scmp.ne.s32.totalorder %s2318_s1, %s2125_s22  ;;  %s29_s19 = int_to_ptr.vmem [resolvable:$true] %s28_s19 }
   0x4   :  { %p2129_p1 = scmp.lt.u32.totalorder %s2125_s22, %s2318_s1 }
   0x6   :  { %p2131_p2 = pnand %p2129_p1, %p2126_p0 }
   0x8   :  { %2134 = shalt.err (!%p2131_p2)
}
   0x9   :  { %s2135_s27 = scalar_lea.vmem %s29_s19, 16384  ;;  %p2140_p4 = scmp.lt.s32.totalorder %s29_s19, %s29_s19 }
   0xa   :  { %p2136_p3 = scmp.ne.s32.totalorder %s29_s19, %s2135_s27  ;;  %p2141_p5 = scmp.lt.s32.totalorder %s2135_s27, %s2135_s27 }
   0xc   :  { %p2142_p6 = por %p2141_p5, %p2140_p4 }
   0xe   :  { %p2143_p7 = pnand %p2142_p6, %p2136_p3 }
  0x10   :  { %2146 = shalt.err (!%p2143_p7)
}
  0x11   :  { %s2220_s28 = smov 64   ;;  %s2221_s29 = smov 4  }
  0x12   :  { %34 = dma.hbm_to_vmem [thread:$0]  %s2318_s1, 16384, %s29_s19, [#allocation6], %s2220_s28, %s2220_s28, %s2221_s29  }
  0x13   :  { %s2222_s7 = smov [#allocation2]   ;;  %s2223_s9 = smov [#allocation7]  }
  0x14   :  { %s19_s8 = sshll.u32 %s2222_s7, 4  ;;  %s42_s10 = sshll.u32 %s2223_s9, 4  ;;  %s20_s8 = int_to_ptr.vmem [resolvable:$true] %s19_s8  ;;  %s43_s10 = int_to_ptr.vmem [resolvable:$true] %s42_s10 }
  0x15   :  { %s2147_s13 = scalar_lea.hbm %s2317_s0, 1024 }
  0x16   :  { %p2148_p8 = scmp.ne.s32.totalorder %s2317_s0, %s2147_s13  ;;  %p2151_p9 = scmp.lt.u32.totalorder %s2147_s13, %s2317_s0 }
  0x18   :  { %p2153_p10 = pnand %p2151_p9, %p2148_p8 }
  0x1a   :  { %2156 = shalt.err (!%p2153_p10)
}
  0x1b   :  { %s2157_s1 = scalar_lea.vmem %s20_s8, 1024  ;;  %p2162_p12 = scmp.lt.s32.totalorder %s20_s8, %s20_s8 }
  0x1c   :  { %p2158_p11 = scmp.ne.s32.totalorder %s20_s8, %s2157_s1  ;;  %p2163_p13 = scmp.lt.s32.totalorder %s2157_s1, %s2157_s1 }
  0x1e   :  { %p2164_p0 = por %p2163_p13, %p2162_p12 }
  0x20   :  { %p2165_p1 = pnand %p2164_p0, %p2158_p11 }
  0x22   :  { %2168 = shalt.err (!%p2165_p1)
}
  0x23   :  { %22 = dma.hbm_to_vmem [thread:$0]  %s2317_s0, 1024, %s20_s8, [#allocation3]  }
  0x24   :  { %s2169_s22 = scalar_lea.hbm %s2320_s3, 1024 }
  0x25   :  { %p2170_p2 = scmp.ne.s32.totalorder %s2320_s3, %s2169_s22  ;;  %p2173_p3 = scmp.lt.u32.totalorder %s2169_s22, %s2320_s3 }
  0x27   :  { %p2175_p4 = pnand %p2173_p3, %p2170_p2 }
  0x29   :  { %2178 = shalt.err (!%p2175_p4)
}
  0x2a   :  { %s2179_s27 = scalar_lea.vmem %s43_s10, 1024  ;;  %p2184_p6 = scmp.lt.s32.totalorder %s43_s10, %s43_s10 }
  0x2b   :  { %p2180_p5 = scmp.ne.s32.totalorder %s43_s10, %s2179_s27  ;;  %p2185_p7 = scmp.lt.s32.totalorder %s2179_s27, %s2179_s27 }
  0x2d   :  { %p2186_p8 = por %p2185_p7, %p2184_p6 }
  0x2f   :  { %p2187_p9 = pnand %p2186_p8, %p2180_p5 }
  0x31   :  { %2190 = shalt.err (!%p2187_p9)
}
  0x32   :  { %48 = dma.hbm_to_vmem [thread:$0]  %s2320_s3, 1024, %s43_s10, [#allocation6], %s2220_s28, %s2220_s28, %s2221_s29  }
  0x33   :  { %2213 = dma.done.wait [#allocation3], 1024  }
  0x34   :  { %2214 = vsyncadd [#allocation3], 4294966272 }
  0x35   :  { %2215 = dma.done.wait [#allocation6], 17408  }
  0x36   :  { %2216 = vsyncadd [#allocation6], 4294949888  ;;  %v1973_v0 = vld [vmem:[#allocation5 + $0x40] sm:$0xff]   ;;  %v1977_v4 = vld [vmem:[#allocation5 + $0x48] sm:$0xff]   ;;  %vm2225_vm0 = vmmov 0   ;;  %s2226_s6 = smov [#allocation8]  }
  0x37   :  { %v1974_v1 = vld [vmem:[#allocation5 + $0xc0] sm:$0xff]   ;;  %1760 = vmatprep.subr.bf16.mxu0 %v1973_v0  ;;  %v1978_v5 = vld [vmem:[#allocation5 + $0xc8] sm:$0xff]   ;;  %v1981_v8 = vld [vmem:[#allocation5 + $0x50] sm:$0xff]   ;;  %s1596_s7 = sshll.u32 %s2226_s6, 4  ;;  %s1597_s7 = int_to_ptr.vmem [resolvable:$true] %s1596_s7 }
  0x38   :  { %v1975_v2 = vld [vmem:[#allocation5] sm:$0xff]   ;;  %1782 = vmatprep.subr.bf16.mxu1 %v1974_v1  ;;  %v1979_v6 = vld [vmem:[#allocation5 + $0x8] sm:$0xff]   ;;  %v1982_v9 = vld [vmem:[#allocation5 + $0xd0] sm:$0xff]   ;;  %s2191_s8 = scalar_lea.vmem %s1597_s7, 128  ;;  %p2196_p11 = scmp.lt.s32.totalorder %s1597_s7, %s1597_s7 }
  0x39   :  { %v1976_v3 = vld [vmem:[#allocation5 + $0x80] sm:$0xff]   ;;  %1761 = vmatpush3.bf16.msra.mxu0 %v1975_v2  ;;  %v1980_v7 = vld [vmem:[#allocation5 + $0x88] sm:$0xff]   ;;  %v1983_v10 = vld [vmem:[#allocation5 + $0x10] sm:$0xff]   ;;  %p2192_p10 = scmp.ne.s32.totalorder %s1597_s7, %s2191_s8  ;;  %p2197_p12 = scmp.lt.s32.totalorder %s2191_s8, %s2191_s8 }
  0x3a   :  { %1783 = vmatpush3.bf16.msra.mxu1 %v1976_v3  ;;  %1762 = vmatprep.subr.bf16.mxu0 %v1977_v4  ;;  %v1984_v11 = vld [vmem:[#allocation5 + $0x90] sm:$0xff]   ;;  %v1985_v12 = vld [vmem:[#allocation5 + $0x58] sm:$0xff]   ;;  %v1989_v16 = vld [vmem:[#allocation5 + $0x60] sm:$0xff]  }
  0x3b   :  { %1784 = vmatprep.subr.bf16.mxu1 %v1978_v5  ;;  %v1986_v13 = vld [vmem:[#allocation5 + $0xd8] sm:$0xff]   ;;  %v1990_v17 = vld [vmem:[#allocation5 + $0xe0] sm:$0xff]   ;;  %v1993_v20 = vld [vmem:[#allocation5 + $0x68] sm:$0xff]   ;;  %p2198_p13 = por %p2197_p12, %p2196_p11 }
  0x3c   :  { %v1987_v14 = vld [vmem:[#allocation5 + $0x18] sm:$0xff]   ;;  %v1991_v18 = vld [vmem:[#allocation5 + $0x20] sm:$0xff]   ;;  %v1994_v21 = vld [vmem:[#allocation5 + $0xe8] sm:$0xff]  }
  0x3d   :  { %1763 = vmatpush3.bf16.msra.mxu0 %v1979_v6  ;;  %v1988_v15 = vld [vmem:[#allocation5 + $0x98] sm:$0xff]   ;;  %v1992_v19 = vld [vmem:[#allocation5 + $0xa0] sm:$0xff]   ;;  %v1995_v22 = vld [vmem:[#allocation5 + $0x28] sm:$0xff]   ;;  %p2199_p0 = pnand %p2198_p13, %p2192_p10 }
  0x3e   :  { %1785 = vmatpush3.bf16.msra.mxu1 %v1980_v7  ;;  %1764 = vmatprep.subr.bf16.mxu0 %v1981_v8  ;;  %v1996_v23 = vld [vmem:[#allocation5 + $0xa8] sm:$0xff]   ;;  %v1997_v24 = vld [vmem:[#allocation5 + $0x70] sm:$0xff]   ;;  %v2001_v28 = vld [vmem:[#allocation5 + $0x78] sm:$0xff]  }
  0x3f   :  { %1786 = vmatprep.subr.bf16.mxu1 %v1982_v9  ;;  %v1998_v25 = vld [vmem:[#allocation5 + $0xf0] sm:$0xff]   ;;  %v2002_v29 = vld [vmem:[#allocation5 + $0xf8] sm:$0xff]   ;;  %v61_v32 = vld [vmem:[#allocation2] sm:$0xff] }
  0x40   :  { %v1999_v26 = vld [vmem:[#allocation5 + $0x30] sm:$0xff]   ;;  %v2003_v30 = vld [vmem:[#allocation5 + $0x38] sm:$0xff]   ;;  %v62_v33 = vld [vmem:[#allocation2 + $0x8] sm:$0xff]  ;;  %v1607_v34 = vcombine.low %v61_v32, %v61_v32  ;;  %v1608_v35 = vcombine.high %v61_v32, %v61_v32 }
  0x41   :  { %1765 = vmatpush3.bf16.msra.mxu0 %v1983_v10  ;;  %v2000_v27 = vld [vmem:[#allocation5 + $0xb0] sm:$0xff]   ;;  %v2004_v31 = vld [vmem:[#allocation5 + $0xb8] sm:$0xff]   ;;  %v1609_v36 = vcombine.low %v62_v33, %v62_v33  ;;  %v1610_v37 = vcombine.high %v62_v33, %v62_v33  ;;  %v2009_v38 = vld [vmem:[#allocation5 + $0x140] sm:$0xff]  }
  0x42   :  { %1787 = vmatpush3.bf16.msra.mxu1 %v1984_v11  ;;  %1766 = vmatprep.subr.bf16.mxu0 %v1985_v12  ;;  %v2010_v39 = vld [vmem:[#allocation5 + $0x1c0] sm:$0xff]   ;;  %v2013_v42 = vld [vmem:[#allocation5 + $0x148] sm:$0xff]   ;;  %v2017_v46 = vld [vmem:[#allocation5 + $0x150] sm:$0xff]  }
  0x43   :  { %1788 = vmatprep.subr.bf16.mxu1 %v1986_v13  ;;  %1188 = vmatprep.mubr.bf16.mxu0 %v1608_v35  ;;  %v2011_v40 = vld [vmem:[#allocation5 + $0x100] sm:$0xff]   ;;  %v2014_v43 = vld [vmem:[#allocation5 + $0x1c8] sm:$0xff]   ;;  %v2018_v47 = vld [vmem:[#allocation5 + $0x1d0] sm:$0xff]  }
  0x44   :  { %1228 = vmatprep.mubr.bf16.mxu1 %v1610_v37  ;;  %v2012_v41 = vld [vmem:[#allocation5 + $0x180] sm:$0xff]   ;;  %v2015_v44 = vld [vmem:[#allocation5 + $0x108] sm:$0xff]   ;;  %v2019_v48 = vld [vmem:[#allocation5 + $0x110] sm:$0xff]  }
  0x45   :  { %1767 = vmatpush3.bf16.msra.mxu0 %v1987_v14  ;;  %v2016_v45 = vld [vmem:[#allocation5 + $0x188] sm:$0xff]   ;;  %v2020_v49 = vld [vmem:[#allocation5 + $0x190] sm:$0xff]   ;;  %v2021_v50 = vld [vmem:[#allocation5 + $0x158] sm:$0xff]  }
  0x46   :  { %1789 = vmatpush3.bf16.msra.mxu1 %v1988_v15  ;;  %1768 = vmatprep.subr.bf16.mxu0 %v1989_v16  ;;  %v2022_v51 = vld [vmem:[#allocation5 + $0x1d8] sm:$0xff]   ;;  %v2025_v54 = vld [vmem:[#allocation5 + $0x160] sm:$0xff]   ;;  %v2029_v58 = vld [vmem:[#allocation5 + $0x168] sm:$0xff]  }
  0x47   :  { %1790 = vmatprep.subr.bf16.mxu1 %v1990_v17  ;;  %v2023_v52 = vld [vmem:[#allocation5 + $0x118] sm:$0xff]   ;;  %v2026_v55 = vld [vmem:[#allocation5 + $0x1e0] sm:$0xff]   ;;  %v2030_v59 = vld [vmem:[#allocation5 + $0x1e8] sm:$0xff]  }
  0x48   :  { %v2024_v53 = vld [vmem:[#allocation5 + $0x198] sm:$0xff]   ;;  %v2027_v56 = vld [vmem:[#allocation5 + $0x120] sm:$0xff]   ;;  %v2031_v60 = vld [vmem:[#allocation5 + $0x128] sm:$0xff]  }
  0x49   :  { %1769 = vmatpush3.bf16.msra.mxu0 %v1991_v18  ;;  %v2028_v57 = vld [vmem:[#allocation5 + $0x1a0] sm:$0xff]   ;;  %v2032_v61 = vld [vmem:[#allocation5 + $0x1a8] sm:$0xff]   ;;  %v2033_v62 = vld [vmem:[#allocation5 + $0x170] sm:$0xff]  }
  0x4a   :  { %1791 = vmatpush3.bf16.msra.mxu1 %v1992_v19  ;;  %1770 = vmatprep.subr.bf16.mxu0 %v1993_v20  ;;  %v2034_v63 = vld [vmem:[#allocation5 + $0x1f0] sm:$0xff]   ;;  %v2037_v2 = vld [vmem:[#allocation5 + $0x178] sm:$0xff]   ;;  %v2045_v12 = vld [vmem:[#allocation5 + $0x240] sm:$0xff]  }
  0x4b   :  { %1792 = vmatprep.subr.bf16.mxu1 %v1994_v21  ;;  %v2035_v0 = vld [vmem:[#allocation5 + $0x130] sm:$0xff]   ;;  %v2038_v3 = vld [vmem:[#allocation5 + $0x1f8] sm:$0xff]   ;;  %v2046_v13 = vld [vmem:[#allocation5 + $0x2c0] sm:$0xff]  }
  0x4c   :  { %v2036_v1 = vld [vmem:[#allocation5 + $0x1b0] sm:$0xff]   ;;  %v2039_v4 = vld [vmem:[#allocation5 + $0x138] sm:$0xff]   ;;  %v2047_v14 = vld [vmem:[#allocation5 + $0x200] sm:$0xff]  }
  0x4d   :  { %1771 = vmatpush3.bf16.msra.mxu0 %v1995_v22  ;;  %v2040_v5 = vld [vmem:[#allocation5 + $0x1b8] sm:$0xff]   ;;  %v63_v6 = vld [vmem:[#allocation2 + $0x10] sm:$0xff]  ;;  %v2048_v15 = vld [vmem:[#allocation5 + $0x280] sm:$0xff]  }
  0x4e   :  { %1793 = vmatpush3.bf16.msra.mxu1 %v1996_v23  ;;  %1772 = vmatprep.subr.bf16.mxu0 %v1997_v24  ;;  %v1611_v7 = vcombine.low %v63_v6, %v63_v6  ;;  %v1612_v8 = vcombine.high %v63_v6, %v63_v6  ;;  %v64_v9 = vld [vmem:[#allocation2 + $0x18] sm:$0xff]  ;;  %v2049_v16 = vld [vmem:[#allocation5 + $0x248] sm:$0xff]   ;;  %v2053_v20 = vld [vmem:[#allocation5 + $0x250] sm:$0xff]  }
  0x4f   :  { %1794 = vmatprep.subr.bf16.mxu1 %v1998_v25  ;;  %v1613_v10 = vcombine.low %v64_v9, %v64_v9  ;;  %v1614_v11 = vcombine.high %v64_v9, %v64_v9  ;;  %v2050_v17 = vld [vmem:[#allocation5 + $0x2c8] sm:$0xff]   ;;  %v2054_v21 = vld [vmem:[#allocation5 + $0x2d0] sm:$0xff]   ;;  %v2057_v24 = vld [vmem:[#allocation5 + $0x258] sm:$0xff]  }
  0x50   :  { %v2051_v18 = vld [vmem:[#allocation5 + $0x208] sm:$0xff]   ;;  %v2055_v22 = vld [vmem:[#allocation5 + $0x210] sm:$0xff]   ;;  %v2058_v25 = vld [vmem:[#allocation5 + $0x2d8] sm:$0xff]  }
  0x51   :  { %1773 = vmatpush3.bf16.msra.mxu0 %v1999_v26  ;;  %v2052_v19 = vld [vmem:[#allocation5 + $0x288] sm:$0xff]   ;;  %v2056_v23 = vld [vmem:[#allocation5 + $0x290] sm:$0xff]   ;;  %v2059_v26 = vld [vmem:[#allocation5 + $0x218] sm:$0xff]  }
  0x52   :  { %1795 = vmatpush3.bf16.msra.mxu1 %v2000_v27  ;;  %1774 = vmatprep.subr.bf16.mxu0 %v2001_v28  ;;  %v2060_v27 = vld [vmem:[#allocation5 + $0x298] sm:$0xff]   ;;  %v2061_v28 = vld [vmem:[#allocation5 + $0x260] sm:$0xff]   ;;  %v2065_v32 = vld [vmem:[#allocation5 + $0x268] sm:$0xff]  }
  0x53   :  { %1796 = vmatprep.subr.bf16.mxu1 %v2002_v29  ;;  %v2062_v29 = vld [vmem:[#allocation5 + $0x2e0] sm:$0xff]   ;;  %v2066_v33 = vld [vmem:[#allocation5 + $0x2e8] sm:$0xff]   ;;  %v2070_v37 = vld [vmem:[#allocation5 + $0x2f0] sm:$0xff]  }
  0x54   :  { %v2068_v35 = vld [vmem:[#allocation5 + $0x2a8] sm:$0xff]  }
  0x55   :  { %1775 = vmatpush3.bf16.msra.mxu0 %v2003_v30  ;;  %v2063_v30 = vld [vmem:[#allocation5 + $0x220] sm:$0xff]   ;;  %v2101_v6 = vld [vmem:[#allocation5 + $0x368] sm:$0xff]  }
  0x56   :  { %1797 = vmatpush3.bf16.msra.mxu1 %v2004_v31  ;;  %1804 = vmatprep.subr.bf16.mxu0 %v2009_v38  ;;  %v2064_v31 = vld [vmem:[#allocation5 + $0x2a0] sm:$0xff]   ;;  %v2071_v38 = vld [vmem:[#allocation5 + $0x230] sm:$0xff]   ;;  %v2104_v9 = vld [vmem:[#allocation5 + $0x3a8] sm:$0xff]  }
  0x57   :  { %1826 = vmatprep.subr.bf16.mxu1 %v2010_v39  ;;  %v2072_v39 = vld [vmem:[#allocation5 + $0x2b0] sm:$0xff]  }
  0x58   :  { %1189 = vmatmul.mubr.bf16.vlgmr.msra.gmra.mrb[0].mxu0 %v1607_v34  ;;  %v2067_v34 = vld [vmem:[#allocation5 + $0x228] sm:$0xff]  }
  0x59   :  { %1229 = vmatmul.mubr.bf16.vlgmr.msra.gmra.mrb[0].mxu1 %v1609_v36  ;;  %1805 = vmatpush3.bf16.msra.mxu0 %v2011_v40  ;;  %v2069_v36 = vld [vmem:[#allocation5 + $0x270] sm:$0xff]   ;;  %v2073_v40 = vld [vmem:[#allocation5 + $0x278] sm:$0xff]  }
  0x5a   :  { %1827 = vmatpush3.bf16.msra.mxu1 %v2012_v41  ;;  %1806 = vmatprep.subr.bf16.mxu0 %v2013_v42  ;;  %v2074_v41 = vld [vmem:[#allocation5 + $0x2f8] sm:$0xff]  }
  0x5b   :  { %1828 = vmatprep.subr.bf16.mxu1 %v2014_v43  ;;  %1268 = vmatprep.mubr.bf16.mxu0 %v1612_v8  ;;  %v2075_v42 = vld [vmem:[#allocation5 + $0x238] sm:$0xff]   ;;  %v2103_v8 = vld [vmem:[#allocation5 + $0x328] sm:$0xff]  }
  0x5c   :  { %1308 = vmatprep.mubr.bf16.mxu1 %v1614_v11  ;;  %v2076_v43 = vld [vmem:[#allocation5 + $0x2b8] sm:$0xff]   ;;  %v2106_v11 = vld [vmem:[#allocation5 + $0x3f0] sm:$0xff]  }
  0x5d   :  { %1807 = vmatpush3.bf16.msra.mxu0 %v2015_v44  ;;  %v65_v44 = vld [vmem:[#allocation2 + $0x20] sm:$0xff] }
  0x5e   :  { %1829 = vmatpush3.bf16.msra.mxu1 %v2016_v45  ;;  %1808 = vmatprep.subr.bf16.mxu0 %v2017_v46  ;;  %v66_v45 = vld [vmem:[#allocation2 + $0x28] sm:$0xff]  ;;  %v1615_v46 = vcombine.low %v65_v44, %v65_v44 }
  0x5f   :  { %1830 = vmatprep.subr.bf16.mxu1 %v2018_v47  ;;  %v1616_v47 = vcombine.high %v65_v44, %v65_v44 }
  0x61   :  { %1809 = vmatpush3.bf16.msra.mxu0 %v2019_v48  ;;  %v1617_v48 = vcombine.low %v66_v45, %v66_v45 }
  0x62   :  { %1831 = vmatpush3.bf16.msra.mxu1 %v2020_v49  ;;  %1810 = vmatprep.subr.bf16.mxu0 %v2021_v50  ;;  %v1618_v49 = vcombine.high %v66_v45, %v66_v45  ;;  %v2081_v50 = vld [vmem:[#allocation5 + $0x340] sm:$0xff]  }
  0x63   :  { %1832 = vmatprep.subr.bf16.mxu1 %v2022_v51  ;;  %v2082_v51 = vld [vmem:[#allocation5 + $0x3c0] sm:$0xff]  }
  0x65   :  { %1811 = vmatpush3.bf16.msra.mxu0 %v2023_v52  ;;  %v2083_v52 = vld [vmem:[#allocation5 + $0x300] sm:$0xff]  }
  0x66   :  { %1833 = vmatpush3.bf16.msra.mxu1 %v2024_v53  ;;  %1812 = vmatprep.subr.bf16.mxu0 %v2025_v54  ;;  %v2084_v53 = vld [vmem:[#allocation5 + $0x380] sm:$0xff]   ;;  %v2085_v54 = vld [vmem:[#allocation5 + $0x348] sm:$0xff]  }
  0x67   :  { %1834 = vmatprep.subr.bf16.mxu1 %v2026_v55  ;;  %v2086_v55 = vld [vmem:[#allocation5 + $0x3c8] sm:$0xff]  }
  0x69   :  { %1813 = vmatpush3.bf16.msra.mxu0 %v2027_v56  ;;  %v2087_v56 = vld [vmem:[#allocation5 + $0x308] sm:$0xff]  }
  0x6a   :  { %1835 = vmatpush3.bf16.msra.mxu1 %v2028_v57  ;;  %1814 = vmatprep.subr.bf16.mxu0 %v2029_v58  ;;  %v2088_v57 = vld [vmem:[#allocation5 + $0x388] sm:$0xff]   ;;  %v2089_v58 = vld [vmem:[#allocation5 + $0x350] sm:$0xff]  }
  0x6b   :  { %1836 = vmatprep.subr.bf16.mxu1 %v2030_v59  ;;  %v2090_v59 = vld [vmem:[#allocation5 + $0x3d0] sm:$0xff]  }
  0x6d   :  { %1815 = vmatpush3.bf16.msra.mxu0 %v2031_v60  ;;  %v2091_v60 = vld [vmem:[#allocation5 + $0x310] sm:$0xff]  }
  0x6e   :  { %1837 = vmatpush3.bf16.msra.mxu1 %v2032_v61  ;;  %1816 = vmatprep.subr.bf16.mxu0 %v2033_v62  ;;  %v2092_v61 = vld [vmem:[#allocation5 + $0x390] sm:$0xff]   ;;  %v2093_v62 = vld [vmem:[#allocation5 + $0x358] sm:$0xff]  }
  0x6f   :  { %1838 = vmatprep.subr.bf16.mxu1 %v2034_v63  ;;  %v2094_v63 = vld [vmem:[#allocation5 + $0x3d8] sm:$0xff]  }
  0x71   :  { %1817 = vmatpush3.bf16.msra.mxu0 %v2035_v0  ;;  %v2095_v0 = vld [vmem:[#allocation5 + $0x318] sm:$0xff]  }
  0x72   :  { %1839 = vmatpush3.bf16.msra.mxu1 %v2036_v1  ;;  %1818 = vmatprep.subr.bf16.mxu0 %v2037_v2  ;;  %v2096_v1 = vld [vmem:[#allocation5 + $0x398] sm:$0xff]   ;;  %v2097_v2 = vld [vmem:[#allocation5 + $0x360] sm:$0xff]  }
  0x73   :  { %1840 = vmatprep.subr.bf16.mxu1 %v2038_v3  ;;  %v2098_v3 = vld [vmem:[#allocation5 + $0x3e0] sm:$0xff]  }
  0x75   :  { %1819 = vmatpush3.bf16.msra.mxu0 %v2039_v4  ;;  %v2099_v4 = vld [vmem:[#allocation5 + $0x320] sm:$0xff]  }
  0x76   :  { %1841 = vmatpush3.bf16.msra.mxu1 %v2040_v5  ;;  %1848 = vmatprep.subr.bf16.mxu0 %v2045_v12  ;;  %v2100_v5 = vld [vmem:[#allocation5 + $0x3a0] sm:$0xff]   ;;  %v2107_v12 = vld [vmem:[#allocation5 + $0x330] sm:$0xff]  }
  0x77   :  { %1870 = vmatprep.subr.bf16.mxu1 %v2046_v13  ;;  %v2108_v13 = vld [vmem:[#allocation5 + $0x3b0] sm:$0xff]  }
  0x78   :  { %1269 = vmatmul.mubr.bf16.vlgmr.msra.gmra.mrb[4].mxu0 %v1611_v7  ;;  %v2102_v7 = vld [vmem:[#allocation5 + $0x3e8] sm:$0xff]  }
  0x79   :  { %1309 = vmatmul.mubr.bf16.vlgmr.msra.gmra.mrb[4].mxu1 %v1613_v10  ;;  %1849 = vmatpush3.bf16.msra.mxu0 %v2047_v14  ;;  %v2105_v10 = vld [vmem:[#allocation5 + $0x370] sm:$0xff]   ;;  %v2109_v14 = vld [vmem:[#allocation5 + $0x378] sm:$0xff]  }
  0x7a   :  { %1871 = vmatpush3.bf16.msra.mxu1 %v2048_v15  ;;  %1850 = vmatprep.subr.bf16.mxu0 %v2049_v16  ;;  %v2110_v15 = vld [vmem:[#allocation5 + $0x3f8] sm:$0xff]  }
  0x7b   :  { %1872 = vmatprep.subr.bf16.mxu1 %v2050_v17  ;;  %1348 = vmatprep.mubr.bf16.mxu0 %v1616_v47  ;;  %v2111_v16 = vld [vmem:[#allocation5 + $0x338] sm:$0xff]  }
  0x7c   :  { %1388 = vmatprep.mubr.bf16.mxu1 %v1618_v49  ;;  %v2112_v17 = vld [vmem:[#allocation5 + $0x3b8] sm:$0xff]  }
  0x7d   :  { %1851 = vmatpush3.bf16.msra.mxu0 %v2051_v18  ;;  %v67_v18 = vld [vmem:[#allocation2 + $0x30] sm:$0xff] }
  0x7e   :  { %1873 = vmatpush3.bf16.msra.mxu1 %v2052_v19  ;;  %1852 = vmatprep.subr.bf16.mxu0 %v2053_v20  ;;  %v68_v19 = vld [vmem:[#allocation2 + $0x38] sm:$0xff]  ;;  %v1619_v20 = vcombine.low %v67_v18, %v67_v18 }
  0x7f   :  { %1874 = vmatprep.subr.bf16.mxu1 %v2054_v21  ;;  %v1620_v21 = vcombine.high %v67_v18, %v67_v18 }
  0x81   :  { %1853 = vmatpush3.bf16.msra.mxu0 %v2055_v22  ;;  %v1621_v22 = vcombine.low %v68_v19, %v68_v19 }
  0x82   :  { %1875 = vmatpush3.bf16.msra.mxu1 %v2056_v23  ;;  %1854 = vmatprep.subr.bf16.mxu0 %v2057_v24  ;;  %v1622_v23 = vcombine.high %v68_v19, %v68_v19  ;;  %v2117_v24 = vld [vmem:[#allocation7] sm:$0xff]  }
  0x83   :  { %1876 = vmatprep.subr.bf16.mxu1 %v2058_v25  ;;  %v2224_v25 = vmov 0.0  }
  0x85   :  { %1855 = vmatpush3.bf16.msra.mxu0 %v2059_v26  ;;  %v2118_v26 = vld [vmem:[#allocation7 + $0x8] sm:$0xff]  }
  0x86   :  { %1877 = vmatpush3.bf16.msra.mxu1 %v2060_v27  ;;  %1856 = vmatprep.subr.bf16.mxu0 %v2061_v28  ;;  %v2119_v27 = vld [vmem:[#allocation7 + $0x10] sm:$0xff]   ;;  %v2120_v28 = vld [vmem:[#allocation7 + $0x18] sm:$0xff]  }
  0x87   :  { %1878 = vmatprep.subr.bf16.mxu1 %v2062_v29  ;;  %v2121_v29 = vld [vmem:[#allocation7 + $0x20] sm:$0xff]  }
  0x89   :  { %1857 = vmatpush3.bf16.msra.mxu0 %v2063_v30  ;;  %v2122_v30 = vld [vmem:[#allocation7 + $0x28] sm:$0xff]  }
  0x8a   :  { %1879 = vmatpush3.bf16.msra.mxu1 %v2064_v31  ;;  %1858 = vmatprep.subr.bf16.mxu0 %v2065_v32  ;;  %v2123_v31 = vld [vmem:[#allocation7 + $0x30] sm:$0xff]   ;;  %v2124_v32 = vld [vmem:[#allocation7 + $0x38] sm:$0xff]  }
  0x8b   :  { %1880 = vmatprep.subr.bf16.mxu1 %v2066_v33 }
  0x8d   :  { %1859 = vmatpush3.bf16.msra.mxu0 %v2067_v34 }
  0x8e   :  { %1881 = vmatpush3.bf16.msra.mxu1 %v2068_v35  ;;  %1860 = vmatprep.subr.bf16.mxu0 %v2069_v36  ;;  %v1606_v35 = vld [vmem:[%s2319_s2] ss:$0 sm:$0xff] }
  0x8f   :  { %1882 = vmatprep.subr.bf16.mxu1 %v2070_v37 }
  0x91   :  { %1861 = vmatpush3.bf16.msra.mxu0 %v2071_v38 }
  0x92   :  { %1883 = vmatpush3.bf16.msra.mxu1 %v2072_v39  ;;  %1862 = vmatprep.subr.bf16.mxu0 %v2073_v40 }
  0x93   :  { %1884 = vmatprep.subr.bf16.mxu1 %v2074_v41 }
  0x95   :  { %1863 = vmatpush3.bf16.msra.mxu0 %v2075_v42 }
  0x96   :  { %1885 = vmatpush3.bf16.msra.mxu1 %v2076_v43  ;;  %1892 = vmatprep.subr.bf16.mxu0 %v2081_v50 }
  0x97   :  { %1914 = vmatprep.subr.bf16.mxu1 %v2082_v51 }
  0x98   :  { %1349 = vmatmul.mubr.bf16.vlgmr.msra.gmra.mrb[8].mxu0 %v1615_v46 }
  0x99   :  { %1389 = vmatmul.mubr.bf16.vlgmr.msra.gmra.mrb[8].mxu1 %v1617_v48  ;;  %1893 = vmatpush3.bf16.msra.mxu0 %v2083_v52 }
  0x9a   :  { %1915 = vmatpush3.bf16.msra.mxu1 %v2084_v53  ;;  %1894 = vmatprep.subr.bf16.mxu0 %v2085_v54 }
  0x9b   :  { %1916 = vmatprep.subr.bf16.mxu1 %v2086_v55  ;;  %1428 = vmatprep.mubr.bf16.mxu0 %v1620_v21 }
  0x9c   :  { %1468 = vmatprep.mubr.bf16.mxu1 %v1622_v23 }
  0x9d   :  { %1895 = vmatpush3.bf16.msra.mxu0 %v2087_v56 }
  0x9e   :  { %1917 = vmatpush3.bf16.msra.mxu1 %v2088_v57  ;;  %1896 = vmatprep.subr.bf16.mxu0 %v2089_v58 }
  0x9f   :  { %1918 = vmatprep.subr.bf16.mxu1 %v2090_v59 }
  0xa1   :  { %1897 = vmatpush3.bf16.msra.mxu0 %v2091_v60 }
  0xa2   :  { %1919 = vmatpush3.bf16.msra.mxu1 %v2092_v61  ;;  %1898 = vmatprep.subr.bf16.mxu0 %v2093_v62 }
  0xa3   :  { %1920 = vmatprep.subr.bf16.mxu1 %v2094_v63 }
  0xa5   :  { %1899 = vmatpush3.bf16.msra.mxu0 %v2095_v0 }
  0xa6   :  { %1921 = vmatpush3.bf16.msra.mxu1 %v2096_v1  ;;  %1900 = vmatprep.subr.bf16.mxu0 %v2097_v2 }
  0xa7   :  { %1922 = vmatprep.subr.bf16.mxu1 %v2098_v3 }
  0xa9   :  { %1901 = vmatpush3.bf16.msra.mxu0 %v2099_v4 }
  0xaa   :  { %1923 = vmatpush3.bf16.msra.mxu1 %v2100_v5  ;;  %1902 = vmatprep.subr.bf16.mxu0 %v2101_v6 }
  0xab   :  { %1924 = vmatprep.subr.bf16.mxu1 %v2102_v7 }
  0xad   :  { %1903 = vmatpush3.bf16.msra.mxu0 %v2103_v8 }
  0xae   :  { %1925 = vmatpush3.bf16.msra.mxu1 %v2104_v9  ;;  %1904 = vmatprep.subr.bf16.mxu0 %v2105_v10 }
  0xaf   :  { %1926 = vmatprep.subr.bf16.mxu1 %v2106_v11 }
  0xb1   :  { %1905 = vmatpush3.bf16.msra.mxu0 %v2107_v12 }
  0xb2   :  { %1927 = vmatpush3.bf16.msra.mxu1 %v2108_v13  ;;  %1906 = vmatprep.subr.bf16.mxu0 %v2109_v14 }
  0xb3   :  { %1928 = vmatprep.subr.bf16.mxu1 %v2110_v15 }
  0xb5   :  { %1907 = vmatpush3.bf16.msra.mxu0 %v2111_v16 }
  0xb6   :  { %1929 = vmatpush3.bf16.msra.mxu1 %v2112_v17  ;;  %1945 = vmatprep.subr.bf16.mxu0 %v2224_v25 }
  0xb8   :  { %1429 = vmatmul.mubr.bf16.vlgmr.msra.gmra.mrb[12].mxu0 %v1619_v20  ;;  %v1751_v20 = vld [vmem:[%s2321_s4] ss:$0 sm:$0xff] }
  0xb9   :  { %1469 = vmatmul.mubr.bf16.vlgmr.msra.gmra.mrb[12].mxu1 %v1621_v22  ;;  %1946 = vmatpush3.bf16.msra.mxu0 %v2117_v24 }
  0xba   :  { %1947 = vmatprep.subr.bf16.mxu0 %v2224_v25  ;;  %1961 = vmatprep.mubr.msk.bf16.mxu0 %vm2225_vm0, %v2224_v25 }
  0xbd   :  { %1948 = vmatpush3.bf16.msra.mxu0 %v2118_v26 }
  0xbe   :  { %1949 = vmatprep.subr.bf16.mxu0 %v2224_v25 }
  0xc1   :  { %1950 = vmatpush3.bf16.msra.mxu0 %v2119_v27 }
  0xc2   :  { %1951 = vmatprep.subr.bf16.mxu0 %v2224_v25 }
  0xc5   :  { %1952 = vmatpush3.bf16.msra.mxu0 %v2120_v28 }
  0xc6   :  { %1953 = vmatprep.subr.bf16.mxu0 %v2224_v25 }
  0xc9   :  { %1954 = vmatpush3.bf16.msra.mxu0 %v2121_v29 }
  0xca   :  { %1955 = vmatprep.subr.bf16.mxu0 %v2224_v25 }
  0xcd   :  { %1956 = vmatpush3.bf16.msra.mxu0 %v2122_v30 }
  0xce   :  { %1957 = vmatprep.subr.bf16.mxu0 %v2224_v25 }
  0xd1   :  { %1958 = vmatpush3.bf16.msra.mxu0 %v2123_v31 }
  0xd2   :  { %1959 = vmatprep.subr.bf16.mxu0 %v2224_v25 }
  0xd5   :  { %1960 = vmatpush3.bf16.msra.mxu0 %v2124_v32 }
 0x12b   :  { %v1776_v33 = vpop.f32.mrb[0].mxu0 }
 0x12c   :  { %v1798_v34 = vpop.f32.mrb[0].mxu1  ;;  %v1777_v36 = vpop.f32.mrb[1].mxu0 }
 0x12d   :  { %v1799_v37 = vpop.f32.mrb[1].mxu1  ;;  %v1778_v38 = vadd.f32 %v1777_v36, %v1776_v33  ;;  %v1779_v40 = vpop.f32.mrb[2].mxu0 }
 0x12e   :  { %v1800_v39 = vadd.f32 %v1799_v37, %v1798_v34  ;;  %v1801_v41 = vpop.f32.mrb[2].mxu1  ;;  %v1780_v42 = vpop.f32.mrb[3].mxu0 }
 0x12f   :  { %v1802_v43 = vpop.f32.mrb[3].mxu1  ;;  %v1191_v44 = vadd.f32 %v1778_v38, %v1606_v35 }
 0x131   :  { %v1231_v45 = vadd.f32 %v1800_v39, %v1191_v44 }
 0x14b   :  { %v1820_v46 = vpop.f32.mrb[4].mxu0 }
 0x14c   :  { %v1842_v47 = vpop.f32.mrb[4].mxu1  ;;  %v1821_v48 = vpop.f32.mrb[5].mxu0 }
 0x14d   :  { %v1843_v49 = vpop.f32.mrb[5].mxu1  ;;  %v1822_v50 = vadd.f32 %v1821_v48, %v1820_v46  ;;  %v1823_v52 = vpop.f32.mrb[6].mxu0 }
 0x14e   :  { %v1844_v51 = vadd.f32 %v1843_v49, %v1842_v47  ;;  %v1845_v53 = vpop.f32.mrb[6].mxu1  ;;  %v1824_v54 = vpop.f32.mrb[7].mxu0 }
 0x14f   :  { %v1846_v55 = vpop.f32.mrb[7].mxu1  ;;  %v1271_v56 = vadd.f32 %v1822_v50, %v1231_v45 }
 0x151   :  { %v1311_v57 = vadd.f32 %v1844_v51, %v1271_v56 }
 0x16b   :  { %v1864_v58 = vpop.f32.mrb[8].mxu0 }
 0x16c   :  { %v1886_v59 = vpop.f32.mrb[8].mxu1  ;;  %v1865_v60 = vpop.f32.mrb[9].mxu0 }
 0x16d   :  { %v1866_v61 = vadd.f32 %v1865_v60, %v1864_v58  ;;  %v1887_v62 = vpop.f32.mrb[9].mxu1  ;;  %v1867_v63 = vpop.f32.mrb[10].mxu0 }
 0x16e   :  { %v1888_v0 = vadd.f32 %v1887_v62, %v1886_v59  ;;  %v1889_v1 = vpop.f32.mrb[10].mxu1  ;;  %v1868_v2 = vpop.f32.mrb[11].mxu0 }
 0x16f   :  { %v1351_v3 = vadd.f32 %v1866_v61, %v1311_v57  ;;  %v1890_v4 = vpop.f32.mrb[11].mxu1 }
 0x171   :  { %v1391_v5 = vadd.f32 %v1888_v0, %v1351_v3 }
 0x18b   :  { %v1908_v6 = vpop.f32.mrb[12].mxu0 }
 0x18c   :  { %v1930_v7 = vpop.f32.mrb[12].mxu1  ;;  %v1909_v8 = vpop.f32.mrb[13].mxu0 }
 0x18d   :  { %v1910_v9 = vadd.f32 %v1909_v8, %v1908_v6  ;;  %v1931_v10 = vpop.f32.mrb[13].mxu1  ;;  %v1911_v11 = vpop.f32.mrb[14].mxu0 }
 0x18e   :  { %v1932_v12 = vadd.f32 %v1931_v10, %v1930_v7  ;;  %v1933_v13 = vpop.f32.mrb[14].mxu1  ;;  %v1912_v14 = vpop.f32.mrb[15].mxu0 }
 0x18f   :  { %v1431_v15 = vadd.f32 %v1910_v9, %v1391_v5  ;;  %v1934_v16 = vpop.f32.mrb[15].mxu1 }
 0x191   :  { %v1471_v17 = vadd.f32 %v1932_v12, %v1431_v15 }
 0x193   :  { %v1476_v18 = vmax.f32 %v1471_v17, 0.0 }
 0x195   :  { %v1477_v19 = vpack.c.bf16 %v1476_v18, %v1476_v18 }
 0x197   :  { %1962 = vmatmul.mubr.bf16.vlgmr.msra.gmra.mrb[16].mxu0 %v1477_v19 }
 0x26a   :  { %v1583_v21 = vpop.f32.mrb[16].mxu0 }
 0x26b   :  { %v1584_v22 = vadd.f32 %v1751_v20, %v1583_v21  ;;  %v1963_v23 = vpop.f32.mrb[17].mxu0 }
 0x26c   :  { %v1586_v24 = vpop.f32.mrb[18].mxu0 }
 0x26d   :  { %1589 = vst [vmem:[#allocation8] sm:$0xff] %v1584_v22  ;;  %v1964_v25 = vpop.f32.mrb[19].mxu0 }
 0x26e   :  { %2202 = shalt.err (!%p2199_p0)
}
 0x26f   :  { %s2203_s4 = scalar_lea.hbm %s2322_s5, 128 }
 0x270   :  { %p2204_p1 = scmp.ne.s32.totalorder %s2322_s5, %s2203_s4  ;;  %p2207_p2 = scmp.lt.u32.totalorder %s2203_s4, %s2322_s5 }
 0x272   :  { %p2209_p3 = pnand %p2207_p2, %p2204_p1 }
 0x274   :  { %2212 = shalt.err (!%p2209_p3)
}
 0x275   :  { %1599 = dma.vmem_to_hbm [thread:$0]  %s1597_s7, 128, %s2322_s5, [#allocation4]  }
 0x276   :  { %2217 = dma.done.wait [#allocation4], 128  }
 0x277   :  { %2218 = vsyncadd [#allocation4], 4294967168 }
 0x278   :  { %1603 = vsyncpa [#allocation3], 1 }
 0x279   :  { %1604 = vsyncpa [#allocation6], 1 }
 0x27a   :  { %1605 = vsyncpa [#allocation4], 1 }

</bundles_post_ra>
